<compile_context>
chip_gen: v6e
topology: v6e:2x2x1
jax: 0.10.0
libtpu: 0.0.40
codegen_flags: <defaults>
</compile_context>

<pallas_src>
import jax
import jax.numpy as jnp
from jax import lax
from jax.experimental import pallas as pl
from jax.experimental.pallas import tpu as pltpu


# --------------------------------------------------------------------------
# kernel body (specialized on the static configuration)
# --------------------------------------------------------------------------
def _make_kernel(*, K, dil, pad, HW, TL, C_in, C_out, has_downsample,
                 multi_tile, compute_dtype):
    cdt = compute_dtype
    W1 = TL + pad          # conv1 output window (extra left `pad` = conv2 context)
    base = HW - 2 * pad    # column of abs time (l*TL - 2*pad) inside x_ctx

    def kernel(*refs):
        idx = 0
        x_ref = refs[idx]; idx += 1                       # (1, C_in, TL)
        if multi_tile:
            h_ref = refs[idx]; idx += 1                   # (1, 1, C_in, HW)
        w1_ref = refs[idx]                                # (C_out, K*C_in)
        b1_ref = refs[idx + 1]                            # (C_out, 1) f32
        w2_ref = refs[idx + 2]                            # (C_out, K*C_out)
        b2_ref = refs[idx + 3]                            # (C_out, 1) f32
        idx += 4
        if has_downsample:
            wd_ref = refs[idx]                            # (C_out, C_in)
            bd_ref = refs[idx + 1]                        # (C_out, 1) f32
            idx += 2
        o_ref = refs[idx]                                 # (1, C_out, TL)

        l = pl.program_id(1)                              # time-tile index
        x_cur = x_ref[0]                                  # (C_in, TL)

        # ---- causal context: [128-aligned halo | current tile] --------------
        # halo columns [HW-2*pad, HW) hold x at abs times [l*TL-2*pad, l*TL)
        # (zeros for l == 0); leading alignment columns are never read.
        if multi_tile:
            halo = h_ref[0, 0]                            # (C_in, HW)
        else:
            halo = jnp.zeros((C_in, HW), x_cur.dtype)
        x_ctx = jnp.concatenate([halo, x_cur], axis=1)    # (C_in, HW + TL)

        # ---- conv1 (dilated, causal) as a single im2col MXU matmul + ReLU ---
        rhs1 = jnp.concatenate(
            [x_ctx[:, base + j * dil: base + j * dil + W1] for j in range(K)],
            axis=0)                                       # (K*C_in, W1)
        acc1 = jnp.dot(w1_ref[...], rhs1.astype(cdt),
                       preferred_element_type=jnp.float32)
        h1 = jnp.maximum(acc1 + b1_ref[...], 0.0)         # (C_out, W1) f32
        # First tile only: conv1 outputs at abs time < 0 are conv2's causal
        # zero padding (bias/ReLU make them nonzero otherwise).  For l > 0 the
        # predicate is always false, so this is a cheap VPU no-op select.
        lane = lax.broadcasted_iota(jnp.int32, (C_out, W1), 1)
        h1 = jnp.where(lane < (pad - l * TL), 0.0, h1)
        # TODO(synk): dropout1 is inference-mode identity (active only in training)

        # ---- conv2 (dilated, causal) as a single im2col MXU matmul + ReLU ---
        rhs2 = jnp.concatenate(
            [h1[:, j * dil: j * dil + TL] for j in range(K)],
            axis=0).astype(cdt)                           # (K*C_out, TL)
        acc2 = jnp.dot(w2_ref[...], rhs2, preferred_element_type=jnp.float32)
        h2 = jnp.maximum(acc2 + b2_ref[...], 0.0)         # (C_out, TL) f32
        # TODO(synk): dropout2 is inference-mode identity

        # ---- residual (1x1 conv or identity) + final ReLU --------------------
        if has_downsample:
            res = jnp.dot(wd_ref[...], x_cur.astype(cdt),
                          preferred_element_type=jnp.float32) + bd_ref[...]
        else:
            res = x_cur.astype(jnp.float32)               # identity (C_in == C_out)
        o_ref[0] = jnp.maximum(h2 + res, 0.0).astype(o_ref.dtype)

    return kernel


# --------------------------------------------------------------------------
# sizing helpers (chip-aware VMEM budget -> time tile)
# --------------------------------------------------------------------------
def _vmem_capacity_bytes():
    try:
        info = pltpu.get_tpu_info()
        cap = getattr(info, "vmem_capacity_bytes", None)
        if cap:
            return int(cap)
    except Exception:
        pass
    return 64 << 20  # conservative fallback (v7x per-TC capacity)


def _halo_width(pad):
    # 2*pad rounded up to a 128-lane boundary (keeps x_cur 128-lane aligned).
    return max(128, ((2 * pad + 127) // 128) * 128)


def _vmem_estimate(C_in, C_out, K, TL, pad, HW, isize, osize, multi_tile):
    W1 = TL + pad
    # double-buffered pipeline blocks
    blocks = 2 * (C_in * TL * isize + C_out * TL * osize)
    if multi_tile:
        blocks += 2 * C_in * HW * isize
    # constant weight / bias blocks (also double-buffered, small)
    weights = 2 * ((K * C_in * C_out + K * C_out * C_out + C_in * C_out) * isize
                   + 2 * C_out * 4)
    # live intermediates (x_ctx, im2col RHS's, f32 activations, residual)
    live = (C_in * (TL + HW) * isize
            + K * C_in * W1 * isize
            + 2 * C_out * W1 * 4
            + K * C_out * TL * isize
            + 3 * C_out * TL * 4)
    return blocks + weights + live + (2 << 20)


_TILE_CANDIDATES = (4096, 2048, 1024, 512, 256, 128)


def _pick_time_tile(L, pad, C_in, C_out, K, isize, osize, budget, max_tile):
    """Return (TL, NL, L_pad, multi_tile, HW)."""
    HW = _halo_width(pad)
    cands = [t for t in _TILE_CANDIDATES if t <= max_tile and t >= HW]
    if not cands:
        cands = [HW]  # tile must at least hold the 2*pad causal halo
    t_best = cands[-1]
    for t in cands:  # descending: largest tile that fits the VMEM budget
        if _vmem_estimate(C_in, C_out, K, t, pad, HW, isize, osize, True) <= budget:
            t_best = t
            break
    if L <= t_best:
        return L, 1, L, False, HW          # single full-length tile, no halo input
    NL = -(-L // t_best)                   # pad L up instead of one giant tile
    return t_best, NL, NL * t_best, True, HW


# --------------------------------------------------------------------------
# wrapper
# --------------------------------------------------------------------------
def temporal_block(x, params, *, kernel_size, stride, dilation, padding,
                   compute_dtype=jnp.bfloat16, out_dtype=jnp.float32,
                   max_time_tile=4096):
    """Inference forward of a TCN TemporalBlock.  x: (B, C_in, L), NCL layout.

    compute_dtype: matmul-input dtype (f32 accumulation + f32 epilogue always).
    out_dtype:     activation output dtype (f32 matches PyTorch; bf16 halves
                   output writeback).  Note: in bf16 compute mode the residual
                   uses the bf16-rounded x (slightly less precise than PyTorch).
    """
    assert stride == 1, "TCN TemporalBlock uses stride=1"
    assert padding == dilation * (kernel_size - 1) and padding > 0, \
        "causal residual block requires padding = dilation * (kernel_size - 1)"
    B, C_in, L = x.shape
    K, dil, pad = kernel_size, dilation, padding
    w1, b1, w2, b2 = params["w1"], params["b1"], params["w2"], params["b2"]
    C_out = w1.shape[0]
    has_downsample = "wd" in params
    assert has_downsample or C_in == C_out, \
        "identity residual requires C_in == C_out (else provide wd/bd)"

    cdt = jnp.dtype(compute_dtype)
    odt = jnp.dtype(out_dtype)
    isize, osize = cdt.itemsize, odt.itemsize

    cap = _vmem_capacity_bytes()
    budget = int(0.70 * cap)
    TL, NL, L_pad, multi_tile, HW = _pick_time_tile(
        L, pad, C_in, C_out, K, isize, osize, budget, max_time_tile)

    # tap-major fused weight layout: column block j (width C) == w[:, :, j]
    w1_f = jnp.transpose(w1, (0, 2, 1)).reshape(C_out, K * C_in).astype(cdt)
    w2_f = jnp.transpose(w2, (0, 2, 1)).reshape(C_out, K * C_out).astype(cdt)
    b1_c = b1.reshape(C_out, 1).astype(jnp.float32)
    b2_c = b2.reshape(C_out, 1).astype(jnp.float32)

    x_in = x.astype(cdt)
    if L_pad > L:
        # causal conv: zero tail cannot affect the kept [0, L) outputs
        x_in = jnp.pad(x_in, ((0, 0), (0, 0), (0, L_pad - L)))

    kernel = _make_kernel(K=K, dil=dil, pad=pad, HW=HW, TL=TL, C_in=C_in,
                          C_out=C_out, has_downsample=has_downsample,
                          multi_tile=multi_tile, compute_dtype=cdt)

    inputs = [x_in]
    in_specs = [pl.BlockSpec((1, C_in, TL), lambda b, l: (b, 0, l))]

    if multi_tile:
        # Compact causal halo per tile: last 2*pad columns of the previous
        # tile (zeros for tile 0), left-padded with zeros to HW lanes.
        body = x_in[:, :, :(NL - 1) * TL].reshape(B, C_in, NL - 1, TL)
        body = body[..., TL - 2 * pad:]                      # (B, C_in, NL-1, 2*pad)
        halos = jnp.concatenate(
            [jnp.zeros((B, C_in, 1, 2 * pad), x_in.dtype), body], axis=2)
        halos = jnp.pad(halos, ((0, 0), (0, 0), (0, 0), (HW - 2 * pad, 0)))
        halos = halos.transpose(0, 2, 1, 3)                   # (B, NL, C_in, HW)
        inputs.append(halos)
        in_specs.append(pl.BlockSpec((1, 1, C_in, HW), lambda b, l: (b, l, 0, 0)))

    inputs += [w1_f, b1_c, w2_f, b2_c]
    in_specs += [
        pl.BlockSpec((C_out, K * C_in), lambda b, l: (0, 0)),
        pl.BlockSpec((C_out, 1), lambda b, l: (0, 0)),
        pl.BlockSpec((C_out, K * C_out), lambda b, l: (0, 0)),
        pl.BlockSpec((C_out, 1), lambda b, l: (0, 0)),
    ]
    if has_downsample:
        wd = params["wd"].reshape(C_out, C_in).astype(cdt)
        bd = params["bd"].reshape(C_out, 1).astype(jnp.float32)
        inputs += [wd, bd]
        in_specs += [pl.BlockSpec((C_out, C_in), lambda b, l: (0, 0)),
                     pl.BlockSpec((C_out, 1), lambda b, l: (0, 0))]

    est = _vmem_estimate(C_in, C_out, K, TL, pad, HW, isize, osize, multi_tile)
    vmem_limit = int(min(max(2 * est, 16 << 20), int(0.9 * cap)))

    out = pl.pallas_call(
        kernel,
        out_shape=jax.ShapeDtypeStruct((B, C_out, L_pad), odt),
        grid=(B, NL),
        in_specs=in_specs,
        out_specs=pl.BlockSpec((1, C_out, TL), lambda b, l: (b, 0, l)),
        compiler_params=pltpu.CompilerParams(
            dimension_semantics=("parallel", "parallel"),
            vmem_limit_bytes=vmem_limit),
    )(*inputs)

    if L_pad > L:
        out = out[:, :, :L]
    return out


# ---------------- pure-JAX reference (for correctness check) ----------------
def _ref_conv1d(x, w, b, stride, padding, dilation):
    out = lax.conv_general_dilated(
        x, w, window_strides=(stride,), padding=[(padding, padding)],
        rhs_dilation=(dilation,), dimension_numbers=("NCH", "OIH", "NCH"))
    return out + b.reshape(-1)[None, :, None]


def _ref_temporal_block(x, params, *, kernel_size, stride, dilation, padding):
    h = _ref_conv1d(x, params["w1"], params["b1"], stride, padding, dilation)
    h = h[:, :, :-padding]                      # Chomp1d
    h = jnp.maximum(h, 0.0)                     # ReLU (dropout: eval identity)
    h = _ref_conv1d(h, params["w2"], params["b2"], stride, padding, dilation)
    h = h[:, :, :-padding]
    h = jnp.maximum(h, 0.0)
    if "wd" in params:
        C_out, C_in = params["w1"].shape[0], x.shape[1]
        wd = params["wd"].reshape(C_out, C_in)
        res = jnp.einsum("oi,bil->bol", wd, x) + params["bd"].reshape(-1)[None, :, None]
    else:
        res = x
    return jnp.maximum(h + res, 0.0)


def _make_params(key, C_in, C_out, K, with_downsample):
    ks = jax.random.split(key, 6)
    p = {
        "w1": 0.2 * jax.random.normal(ks[0], (C_out, C_in, K), jnp.float32),
        "b1": 0.1 * jax.random.normal(ks[1], (C_out,), jnp.float32),
        "w2": 0.2 * jax.random.normal(ks[2], (C_out, C_out, K), jnp.float32),
        "b2": 0.1 * jax.random.normal(ks[3], (C_out,), jnp.float32),
    }
    if with_downsample:
        p["wd"] = 0.2 * jax.random.normal(ks[4], (C_out, C_in, 1), jnp.float32)
        p["bd"] = 0.1 * jax.random.normal(ks[5], (C_out,), jnp.float32)
    return p


if __name__ == "__main__":
    key = jax.random.PRNGKey(0)
    k1, kx1, k2, kx2, k3, kx3, k4, kx4 = jax.random.split(key, 8)

    # --- config 1: downsample path (C_in != C_out), single tile, f32 compute --
    B, C_in, C_out, L, K, dil = 2, 4, 8, 16, 3, 2
    pad = (K - 1) * dil
    params = _make_params(k1, C_in, C_out, K, with_downsample=True)
    x = jax.random.normal(kx1, (B, C_in, L), jnp.float32)
    out = jax.block_until_ready(temporal_block(
        x, params, kernel_size=K, stride=1, dilation=dil, padding=pad,
        compute_dtype=jnp.float32))
    ref = _ref_temporal_block(x, params, kernel_size=K, stride=1,
                              dilation=dil, padding=pad)
    assert out.shape == (B, C_out, L)
    assert jnp.allclose(out, ref, atol=1e-5, rtol=1e-5), "config1 mismatch"

    # --- config 2: identity residual (downsample skipped), f32 compute --------
    C, L2, K2, dil2 = 8, 16, 3, 1
    pad2 = (K2 - 1) * dil2
    params2 = _make_params(k2, C, C, K2, with_downsample=False)
    x2 = jax.random.normal(kx2, (2, C, L2), jnp.float32)
    out2 = jax.block_until_ready(temporal_block(
        x2, params2, kernel_size=K2, stride=1, dilation=dil2, padding=pad2,
        compute_dtype=jnp.float32))
    ref2 = _ref_temporal_block(x2, params2, kernel_size=K2, stride=1,
                               dilation=dil2, padding=pad2)
    assert jnp.allclose(out2, ref2, atol=1e-5, rtol=1e-5), "config2 mismatch"

    # --- config 3: multi-tile with causal halo array, default bf16 compute ----
    Ci3, Co3, L3, K3, dil3 = 8, 16, 512, 3, 8
    pad3 = (K3 - 1) * dil3
    params3 = _make_params(k3, Ci3, Co3, K3, with_downsample=True)
    x3 = jax.random.normal(kx3, (1, Ci3, L3), jnp.float32)
    out3 = jax.block_until_ready(temporal_block(
        x3, params3, kernel_size=K3, stride=1, dilation=dil3, padding=pad3,
        max_time_tile=128))
    ref3 = _ref_temporal_block(x3, params3, kernel_size=K3, stride=1,
                               dilation=dil3, padding=pad3)
    assert out3.shape == (1, Co3, L3)
    assert jnp.allclose(out3, ref3, atol=0.15, rtol=0.1), "config3 mismatch"

    # --- config 4: awkward L (tail-pad path), bf16 compute + bf16 output ------
    Ci4, Co4, L4, K4, dil4 = 8, 8, 200, 3, 4
    pad4 = (K4 - 1) * dil4
    params4 = _make_params(k4, Ci4, Co4, K4, with_downsample=False)
    x4 = jax.random.normal(kx4, (2, Ci4, L4), jnp.float32)
    out4 = jax.block_until_ready(temporal_block(
        x4, params4, kernel_size=K4, stride=1, dilation=dil4, padding=pad4,
        max_time_tile=128, out_dtype=jnp.bfloat16))
    ref4 = _ref_temporal_block(x4, params4, kernel_size=K4, stride=1,
                               dilation=dil4, padding=pad4)
    assert out4.shape == (2, Co4, L4) and out4.dtype == jnp.bfloat16
    assert jnp.allclose(out4.astype(jnp.float32), ref4,
                        atol=0.2, rtol=0.1), "config4 mismatch"

    print("KERNEL_OK")
</pallas_src>

<mosaic_0001>
module attributes {stable_mosaic.version = 11 : i64} {
  func.func @kernel(%arg0: i32, %arg1: i32, %arg2: memref<1x4x16xf32, #tpu.memory_space<vmem>>, %arg3: memref<8x12xf32, #tpu.memory_space<vmem>>, %arg4: memref<8x1xf32, #tpu.memory_space<vmem>>, %arg5: memref<8x24xf32, #tpu.memory_space<vmem>>, %arg6: memref<8x1xf32, #tpu.memory_space<vmem>>, %arg7: memref<8x4xf32, #tpu.memory_space<vmem>>, %arg8: memref<8x1xf32, #tpu.memory_space<vmem>>, %arg9: memref<1x8x16xf32, #tpu.memory_space<vmem>>) attributes {dimension_semantics = [#tpu.dimension_semantics<parallel>, #tpu.dimension_semantics<parallel>], iteration_bounds = array<i64: 2, 1>, scalar_prefetch = 0 : i64, scratch_operands = 0 : i64, tpu.core_type = #tpu.core_type<tc>, window_params = [{transform_indices = @transform_0, window_bounds = array<i64: 1, 4, 16>}, {pipeline_mode = #tpu.pipeline_mode<synchronous>, transform_indices = @transform_1, window_bounds = array<i64: 8, 12>}, {pipeline_mode = #tpu.pipeline_mode<synchronous>, transform_indices = @transform_2, window_bounds = array<i64: 8, 1>}, {pipeline_mode = #tpu.pipeline_mode<synchronous>, transform_indices = @transform_3, window_bounds = array<i64: 8, 24>}, {pipeline_mode = #tpu.pipeline_mode<synchronous>, transform_indices = @transform_4, window_bounds = array<i64: 8, 1>}, {pipeline_mode = #tpu.pipeline_mode<synchronous>, transform_indices = @transform_5, window_bounds = array<i64: 8, 4>}, {pipeline_mode = #tpu.pipeline_mode<synchronous>, transform_indices = @transform_6, window_bounds = array<i64: 8, 1>}, {transform_indices = @transform_7, window_bounds = array<i64: 1, 8, 16>}]} {
    %c0 = arith.constant 0 : index
    %c0_0 = arith.constant 0 : index
    %c0_1 = arith.constant 0 : index
    %0 = vector.load %arg2[%c0, %c0_0, %c0_1] : memref<1x4x16xf32, #tpu.memory_space<vmem>>, vector<1x4x16xf32>
    %1 = vector.shape_cast %0 : vector<1x4x16xf32> to vector<4x16xf32>
    %cst = arith.constant 0.000000e+00 : f32
    %2 = vector.broadcast %cst : f32 to vector<4x128xf32>
    %3 = tpu.concatenate %2, %1 in 1 : vector<4x128xf32>, vector<4x16xf32> -> vector<4x144xf32>
    %4 = vector.extract_strided_slice %3 {offsets = [0, 120], sizes = [4, 20], strides = [1, 1]} : vector<4x144xf32> to vector<4x20xf32>
    %5 = vector.extract_strided_slice %3 {offsets = [0, 122], sizes = [4, 20], strides = [1, 1]} : vector<4x144xf32> to vector<4x20xf32>
    %6 = vector.extract_strided_slice %3 {offsets = [0, 124], sizes = [4, 20], strides = [1, 1]} : vector<4x144xf32> to vector<4x20xf32>
    %7 = tpu.concatenate %4, %5, %6 in 0 : vector<4x20xf32>, vector<4x20xf32>, vector<4x20xf32> -> vector<12x20xf32>
    %c0_2 = arith.constant 0 : index
    %c0_3 = arith.constant 0 : index
    %8 = vector.load %arg3[%c0_2, %c0_3] : memref<8x12xf32, #tpu.memory_space<vmem>>, vector<8x12xf32>
    %cst_4 = arith.constant dense<0.000000e+00> : vector<8x20xf32>
    %9 = tpu.matmul %8, %7, %cst_4 {dimension_numbers = #tpu.dot_dimension_numbers<[1], [0], [0], [1], [0, 0, 1, 1], [], []>} : vector<8x12xf32>, vector<12x20xf32>, vector<8x20xf32> -> vector<8x20xf32>
    %c0_5 = arith.constant 0 : index
    %c0_6 = arith.constant 0 : index
    %10 = vector.load %arg4[%c0_5, %c0_6] : memref<8x1xf32, #tpu.memory_space<vmem>>, vector<8x1xf32>
    %11 = vector.broadcast %10 : vector<8x1xf32> to vector<8x20xf32>
    %12 = arith.addf %9, %11 : vector<8x20xf32>
    %cst_7 = arith.constant 0.000000e+00 : f32
    %13 = vector.broadcast %cst_7 : f32 to vector<8x20xf32>
    %14 = arith.maximumf %12, %13 : vector<8x20xf32>
    %15 = tpu.iota {dimensions = array<i32: 1>} : vector<8x20xi32>
    %c16_i32 = arith.constant 16 : i32
    %16 = arith.muli %arg1, %c16_i32 : i32
    %c4_i32 = arith.constant 4 : i32
    %17 = arith.subi %c4_i32, %16 : i32
    %18 = vector.broadcast %17 : i32 to vector<8x20xi32>
    %19 = arith.cmpi slt, %15, %18 : vector<8x20xi32>
    %cst_8 = arith.constant 0.000000e+00 : f32
    %20 = vector.broadcast %cst_8 : f32 to vector<8x20xf32>
    %21 = arith.select %19, %20, %14 : vector<8x20xi1>, vector<8x20xf32>
    %22 = vector.extract_strided_slice %21 {offsets = [0, 0], sizes = [8, 16], strides = [1, 1]} : vector<8x20xf32> to vector<8x16xf32>
    %23 = vector.extract_strided_slice %21 {offsets = [0, 2], sizes = [8, 16], strides = [1, 1]} : vector<8x20xf32> to vector<8x16xf32>
    %24 = vector.extract_strided_slice %21 {offsets = [0, 4], sizes = [8, 16], strides = [1, 1]} : vector<8x20xf32> to vector<8x16xf32>
    %25 = tpu.concatenate %22, %23, %24 in 0 : vector<8x16xf32>, vector<8x16xf32>, vector<8x16xf32> -> vector<24x16xf32>
    %c0_9 = arith.constant 0 : index
    %c0_10 = arith.constant 0 : index
    %26 = vector.load %arg5[%c0_9, %c0_10] : memref<8x24xf32, #tpu.memory_space<vmem>>, vector<8x24xf32>
    %cst_11 = arith.constant dense<0.000000e+00> : vector<8x16xf32>
    %27 = tpu.matmul %26, %25, %cst_11 {dimension_numbers = #tpu.dot_dimension_numbers<[1], [0], [0], [1], [0, 0, 1, 1], [], []>} : vector<8x24xf32>, vector<24x16xf32>, vector<8x16xf32> -> vector<8x16xf32>
    %c0_12 = arith.constant 0 : index
    %c0_13 = arith.constant 0 : index
    %28 = vector.load %arg6[%c0_12, %c0_13] : memref<8x1xf32, #tpu.memory_space<vmem>>, vector<8x1xf32>
    %29 = vector.broadcast %28 : vector<8x1xf32> to vector<8x16xf32>
    %30 = arith.addf %27, %29 : vector<8x16xf32>
    %cst_14 = arith.constant 0.000000e+00 : f32
    %31 = vector.broadcast %cst_14 : f32 to vector<8x16xf32>
    %32 = arith.maximumf %30, %31 : vector<8x16xf32>
    %c0_15 = arith.constant 0 : index
    %c0_16 = arith.constant 0 : index
    %33 = vector.load %arg7[%c0_15, %c0_16] : memref<8x4xf32, #tpu.memory_space<vmem>>, vector<8x4xf32>
    %cst_17 = arith.constant dense<0.000000e+00> : vector<8x16xf32>
    %34 = tpu.matmul %33, %1, %cst_17 {dimension_numbers = #tpu.dot_dimension_numbers<[1], [0], [0], [1], [0, 0, 1, 1], [], []>} : vector<8x4xf32>, vector<4x16xf32>, vector<8x16xf32> -> vector<8x16xf32>
    %c0_18 = arith.constant 0 : index
    %c0_19 = arith.constant 0 : index
    %35 = vector.load %arg8[%c0_18, %c0_19] : memref<8x1xf32, #tpu.memory_space<vmem>>, vector<8x1xf32>
    %36 = vector.broadcast %35 : vector<8x1xf32> to vector<8x16xf32>
    %37 = arith.addf %34, %36 : vector<8x16xf32>
    %38 = arith.addf %32, %37 : vector<8x16xf32>
    %cst_20 = arith.constant 0.000000e+00 : f32
    %39 = vector.broadcast %cst_20 : f32 to vector<8x16xf32>
    %40 = arith.maximumf %38, %39 : vector<8x16xf32>
    %c0_21 = arith.constant 0 : index
    %c0_22 = arith.constant 0 : index
    %c0_23 = arith.constant 0 : index
    %41 = vector.load %arg9[%c0_21, %c0_22, %c0_23] : memref<1x8x16xf32, #tpu.memory_space<vmem>>, vector<1x8x16xf32>
    %42 = vector.shape_cast %41 : vector<1x8x16xf32> to vector<8x16xf32>
    %43 = vector.shape_cast %40 : vector<8x16xf32> to vector<1x8x16xf32>
    tpu.vector_store %arg9[%c0_21, %c0_22, %c0_23], %43 {strides = array<i32>} : memref<1x8x16xf32, #tpu.memory_space<vmem>>, vector<1x8x16xf32>,
    return
  }
  func.func @transform_0(%arg0: i32, %arg1: i32) -> (i32, i32, i32) {
    %c0_i32 = arith.constant 0 : i32
    %c0_i32_0 = arith.constant 0 : i32
    return %arg0, %c0_i32, %arg1 : i32, i32, i32
  }
  func.func @transform_1(%arg0: i32, %arg1: i32) -> (i32, i32) {
    %c0_i32 = arith.constant 0 : i32
    %c0_i32_0 = arith.constant 0 : i32
    %c0_i32_1 = arith.constant 0 : i32
    return %c0_i32, %c0_i32_0 : i32, i32
  }
  func.func @transform_2(%arg0: i32, %arg1: i32) -> (i32, i32) {
    %c0_i32 = arith.constant 0 : i32
    %c0_i32_0 = arith.constant 0 : i32
    %c0_i32_1 = arith.constant 0 : i32
    return %c0_i32, %c0_i32_0 : i32, i32
  }
  func.func @transform_3(%arg0: i32, %arg1: i32) -> (i32, i32) {
    %c0_i32 = arith.constant 0 : i32
    %c0_i32_0 = arith.constant 0 : i32
    %c0_i32_1 = arith.constant 0 : i32
    return %c0_i32, %c0_i32_0 : i32, i32
  }
  func.func @transform_4(%arg0: i32, %arg1: i32) -> (i32, i32) {
    %c0_i32 = arith.constant 0 : i32
    %c0_i32_0 = arith.constant 0 : i32
    %c0_i32_1 = arith.constant 0 : i32
    return %c0_i32, %c0_i32_0 : i32, i32
  }
  func.func @transform_5(%arg0: i32, %arg1: i32) -> (i32, i32) {
    %c0_i32 = arith.constant 0 : i32
    %c0_i32_0 = arith.constant 0 : i32
    %c0_i32_1 = arith.constant 0 : i32
    return %c0_i32, %c0_i32_0 : i32, i32
  }
  func.func @transform_6(%arg0: i32, %arg1: i32) -> (i32, i32) {
    %c0_i32 = arith.constant 0 : i32
    %c0_i32_0 = arith.constant 0 : i32
    %c0_i32_1 = arith.constant 0 : i32
    return %c0_i32, %c0_i32_0 : i32, i32
  }
  func.func @transform_7(%arg0: i32, %arg1: i32) -> (i32, i32, i32) {
    %c0_i32 = arith.constant 0 : i32
    %c0_i32_0 = arith.constant 0 : i32
    return %arg0, %c0_i32, %arg1 : i32, i32, i32
  }
}

</mosaic_0001>

<bundles_post_ra>
// kernel: tpu_custom_call.1
= control target key start
LH: loop header
LB: loop body
LE: loop exit
PB: predicated region body
PF: predicated region fallthrough
CT: control target
= control target key end

     0   :  { %12 = vsyncpa [#allocation3], 0  ;;  %s1065_s0 = inlined_call_operand.vmem [shape: f32[2,4,16], index: 0, kind: input, shape index: {}]   ;;  %s1066_s1 = inlined_call_operand.vmem [shape: f32[8,12], index: 1, kind: input, shape index: {}]   ;;  %s1067_s2 = inlined_call_operand.vmem [shape: f32[8,1], index: 2, kind: input, shape index: {}]   ;;  %s1068_s3 = inlined_call_operand.vmem [shape: f32[8,24], index: 3, kind: input, shape index: {}]   ;;  %s1069_s4 = inlined_call_operand.vmem [shape: f32[8,1], index: 4, kind: input, shape index: {}]   ;;  %s1070_s5 = inlined_call_operand.vmem [shape: f32[8,4], index: 5, kind: input, shape index: {}]   ;;  %s1071_s6 = inlined_call_operand.vmem [shape: f32[8,1], index: 6, kind: input, shape index: {}]   ;;  %s1072_s7 = inlined_call_operand.hbm [shape: f32[2,8,16], index: 7, kind: output, shape index: {}]  }
   0x1   :  { %14 = vsyncpa [#allocation3 + $0x1], 0  ;;  %s924_s24 = smov 0   ;;  %s926_s25 = smov 0  }
   0x2   :  { %s928_s26 = smov 0   ;;  %s930_s27 = smov 0  }
   0x3   :  { %s932_s28 = smov 0   ;;  %s934_s29 = smov 0  }
   0x4 LB: > { %s688_s30 = sadd.s32 4294967295, %s875_s29   ;;  %s689_s8 = sadd.s32 4294967294, %s875_s29   ;;  %s875_s29 = sphi %s934_s29, %s20_s29   ;;  %s871_s28 = sphi %s932_s28, %s1079_s28   ;;  %s867_s27 = sphi %s930_s27, %s1078_s27   ;;  %s863_s26 = sphi %s928_s26, %s1077_s26   ;;  %s859_s25 = sphi %s926_s25, %s1076_s25   ;;  %s855_s24 = sphi %s924_s24, %s1075_s24  }
   0x5   : > { %s32_s9 = sadd.s32 1, %s871_s28  ;;  %s195_s10 = sadd.s32 1, %s863_s26 }
   0x6   : > { %p34_p0 = scmp.ge.s32.totalorder %s32_s9, 2  ;;  %p205_p1 = scmp.ne.s32.totalorder %s863_s26, %s859_s25 }
   0x7   : > { %p206_p2 = scmp.eq.s32.totalorder %s688_s30, 1  ;;  %p211_p3 = scmp.ne.s32.totalorder %s859_s25, %s855_s24 }
   0x8   : > { %s1081_s9 = smov (%p34_p0, %s32_s9), 0  ;;  %p212_p5 = scmp.eq.s32.totalorder %s689_s8, 1 }
   0x9   : > { %p964_p4 = por %p206_p2, %p205_p1  ;;  %s190_s12 = ssub.s32 %s871_s28, %s1081_s9 }
   0xa   : > { %p692_p6 = scmp.ge.s32.totalorder %s875_s29, 1  ;;  %p193_p7 = scmp.eq.s32.totalorder %s190_s12, 0 }
   0xb   : > { %p971_p8 = por %p212_p5, %p211_p3  ;;  %p258_p9 = scmp.lt.s32.totalorder %s875_s29, 3 }
   0xc   : > { %s977_s14 = scalar_select %p193_p7, %s863_s26, %s195_s10  }
   0xd   : > { %p259_p10 = pnand %p692_p6, %p258_p9 }
   0xe   : > { %s878_s15 = smov (!%p259_p10), 124   ;;  %p292_p11 = scmp.lt.s32.totalorder (!%p259_p10), %s867_s27, 1 }
   0xf   : > { %262 = sbr.rel (%p259_p10) target bundleno = 796 (0x31c), region = 48  ;;  %s879_s16 = smov (!%p259_p10), 126  }
  0x10   : > { %s882_s22 = smov (!%p259_p10), 8   ;;  %s703_s30 = sshll.u32 (!%p259_p10), %s867_s27, 7 }
  0x14   : > { %v877_v0 = vmov 0.0   ;;  %s293_s17 = scalar_select %p292_p11, %s867_s27, 1  ;;  %vm880_vm0 = vmmov 0   ;;  %v881_v6 = vmov 0   ;;  %vm316_vm1 = vcmask 1014784   ;;  %v322_v13 = vld [vmem:[%s1067_s2] sm:$0xff] }
  0x15   : > { %312 = vrot.lane.b32.xlu0 %v877_v0, %s878_s15  ;;  %v302_v1 = vrot.slane %v877_v0, 4  ;;  %715 = vmatprep.subr.mxu0 %v877_v0  ;;  %vm308_vm2 = vcmask 1031168   ;;  %vm318_vm3 = vcmask 1043456   ;;  %v434_v14 = vld [vmem:[%s1069_s4] sm:$0xff]  ;;  %vm338_vm4 = vcmask 64512  }
  0x16   : > { %722 = vmatprep.subr.mxu1 %v877_v0  ;;  %s694_s18 = sshll.u32 %s293_s17, 2  ;;  %719 = vmatprep.mubr.msk.f32.mxu0 %vm880_vm0, %v877_v0  ;;  %v321_v20 = vld [vmem:[%s1066_s1] sm:$0xff]  ;;  %vm342_vm5 = vcmask 97280   ;;  %v419_v22 = vlaneseq  ;;  %vm522_vm6 = vcmask 31744   ;;  %vm440_vm9 = vcmask 195584  }
  0x17   : > { %304 = vrot.lane.b32.xlu1 %v302_v1, %s879_s16  ;;  %s298_s21 = scalar_lea.vmem %s1065_s0, %s694_s18  ;;  %728 = vmatprep.mubr.msk.f32.mxu1 %vm880_vm0, %v877_v0  ;;  %v515_v24 = vld [vmem:[%s1070_s5] sm:$0xff]  ;;  %vm600_vm10 = vcmask 130048   ;;  %s615_s18 = scalar_lea.hbm %s1072_s7, %s703_s30 }
  0x18   : > { %v299_v2 = vld [vmem:[%s298_s21] sm:$0xf]  ;;  %797 = vset.pattern.permute.xlu0 %v881_v6  ;;  %798 = vset.pattern.permute.xlu1 %v881_v6  ;;  %v420_v23 = vand.u32 127, %v419_v22  ;;  %s883_s21 = smov [#allocation2]  }
  0x19   : > { %314 = vrot.lane.b32.xlu0 %v299_v2, %s878_s15  ;;  %v303_v3 = vrot.slane %v299_v2, 4  ;;  %v516_v31 = vld [vmem:[%s1071_s6] sm:$0xff] }
  0x1a   : > { %vm424_vm7 = vcmp.lt.s32.totalorder %v420_v23, 4  ;;  %v433_v34 = vld [vmem:[%s1068_s3] sm:$0xff] }
  0x1b   : > { %306 = vrot.lane.b32.xlu1 %v303_v3, %s879_s16  ;;  %vm697_vm8 = vmneg %vm424_vm7 }
  0x87   : > { %v313_v4 = vpop.permute.xlu0 %312 }
  0x89   : > { %v305_v5 = vpop.permute.xlu1 %304 }
  0x8b   : > { %v315_v7 = vpop.permute.xlu0 %314 }
  0x8c   : > { %336 = vrot.lane.b32.xlu1 %v315_v7, %s882_s22  ;;  %v317_v8 = vsel %vm316_vm1, %v313_v4, %v315_v7 }
  0x8d   : > { %334 = vrot.lane.b32.xlu0 %v317_v8, %s882_s22  ;;  %v307_v9 = vpop.permute.xlu1 %306 }
  0x8e   : > { %v309_v10 = vsel %vm308_vm2, %v305_v5, %v307_v9  ;;  %v320_v11 = vsel %vm318_vm3, %v299_v2, %v307_v9 }
  0x8f   : > { %v319_v12 = vsel %vm318_vm3, 0.0, %v309_v10 }
  0x90   : > { %332 = vrot.lane.b32.xlu1 %v320_v11, %s882_s22 }
  0x91   : > { %330 = vrot.lane.b32.xlu0 %v319_v12, %s882_s22  ;;  %s803_s22 = sshll.u32 %s883_s21, 4  ;;  %s804_s22 = int_to_ptr.vmem [resolvable:$false] %s803_s22 }
  0x92   : > { %s805_s27 = scalar_lea.vmem %s804_s22, 256 }
  0x95   : > { %325 = vperm.xlu0 %797, %v322_v13  }
  0x99   : > { %437 = vperm.xlu0 %797, %v434_v14  }
  0xfe   : > { %v337_v15 = vpop.permute.xlu1 %336 }
  0xff   : > { %v335_v16 = vpop.permute.xlu0 %334 }
 0x100   : > { %v340_v17 = vsel %vm338_vm4, %v335_v16, %v337_v15 }
 0x101   : > { %716 = vmatpush3.msk.msra.mxu0 %vm318_vm3, %v340_v17 }
 0x102   : > { %v333_v18 = vpop.permute.xlu1 %332  ;;  %717 = vmatprep.subr.mxu0 %v877_v0 }
 0x103   : > { %v331_v19 = vpop.permute.xlu0 %330 }
 0x104   : > { %v339_v21 = vsel %vm338_vm4, %v331_v19, %v333_v18 }
 0x105   : > { %718 = vmatpush3.msra.mxu0 %v339_v21 }
 0x106   : > { %720 = vmatmul.mubr.msk.f32.vlgmr.msra.gmra.mxu0 %vm342_vm5, %v321_v20  ;;  %731 = vmatprep.subr.mxu0 %v877_v0 }
 0x107   : > { %732 = vmatpush3.msk.msra.mxu0 %vm318_vm3, %v299_v2  ;;  %733 = vmatprep.mubr.msk.f32.mxu0 %vm880_vm0, %v877_v0 }
 0x10a   : > { %734 = vmatmul.mubr.msk.f32.vlgmr.msra.gmra.mxu0 %vm522_vm6, %v515_v24 }
 0x110   : > { %v326_v25 = vpop.permute.xlu0 %325 }
 0x114   : > { %v438_v38 = vpop.permute.xlu0 %437 }
 0x1c6   : > { %v414_v26 = vpop.f32.mrf.mxu0 }
 0x1c7   : > { %v415_v27 = vadd.f32 %v414_v26, %v326_v25 }
 0x1c8   : > { %v721_v28 = vpop.f32.mrf.mxu0 }
 0x1c9   : > { %v418_v29 = vmax.f32 %v415_v27, 0.0 }
 0x1ca   : > { %v594_v35 = vpop.f32.mrf.mxu0 }
 0x1cb   : > { %v425_v30 = vsel %vm424_vm7, 0.0, %v418_v29 }
 0x1cc   : > { %430 = vrot.lane.b32.xlu1 %v425_v30, %s878_s15  ;;  %v735_v36 = vpop.f32.mrf.mxu0  ;;  %s289_s15 = sand.u32 1, %s859_s25  }
 0x1cd   : > { %s603_s19 = scalar_lea.sflag [#allocation3], %s289_s15 }
 0x1d0   : > { %427 = vrot.lane.b32.xlu1 %v425_v30, %s879_s16  ;;  %s693_s16 = sshll.u32 %s289_s15, 3 }
 0x1d1   : > { %s291_s8 = scalar_lea.vmem [#allocation2], %s693_s16 }
 0x1d2   : > { %s617_s10 = sshll.u32 %s291_s8, 4  ;;  %s618_s10 = int_to_ptr.vmem [resolvable:$true] %s617_s10 }
 0x1d3   : > { %s799_s20 = scalar_lea.vmem %s618_s10, 128  ;;  %p806_p1 = scmp.lt.s32.totalorder %s618_s10, %s804_s22 }
 0x1d4   : > { %519 = vperm.xlu1 %798, %v516_v31   ;;  %p800_p12 = scmp.ne.s32.totalorder %s618_s10, %s799_s20  ;;  %p807_p2 = scmp.lt.s32.totalorder %s805_s27, %s799_s20 }
 0x1d6   : > { %p801_p13 = pnand %p800_p12, %p964_p4  ;;  %p808_p3 = por %p807_p2, %p806_p1 }
 0x1d8   : > { %p802_p0 = pneg %p801_p13 }
 0x1da   : > { %p809_p5 = pnand %p808_p3, %p802_p0 }
 0x23e   : > { %v431_v32 = vpop.permute.xlu1 %430 }
 0x23f   : > { %723 = vmatpush3.msra.mxu1 %v431_v32 }
 0x240   : > { %724 = vmatprep.subr.mxu1 %v877_v0 }
 0x242   : > { %v428_v33 = vpop.permute.xlu1 %427 }
 0x243   : > { %725 = vmatpush3.msra.mxu1 %v428_v33 }
 0x244   : > { %726 = vmatprep.subr.mxu1 %v877_v0 }
 0x245   : > { %727 = vmatpush3.msk.msra.mxu1 %vm697_vm8, %v418_v29 }
 0x246   : > { %729 = vmatmul.mubr.msk.f32.vlgmr.msra.gmra.mxu1 %vm440_vm9, %v433_v34 }
 0x24f   : > { %v520_v37 = vpop.permute.xlu1 %519 }
 0x250   : > { %v595_v41 = vadd.f32 %v594_v35, %v520_v37 }
 0x306   : > { %v510_v39 = vpop.f32.mrf.mxu1 }
 0x307   : > { %v511_v40 = vadd.f32 %v510_v39, %v438_v38 }
 0x308   : > { %v730_v42 = vpop.f32.mrf.mxu1 }
 0x309   : > { %v514_v43 = vmax.f32 %v511_v40, 0.0 }
 0x30b   : > { %v598_v44 = vadd.f32 %v595_v41, %v514_v43 }
 0x30d   : > { %v599_v45 = vmax.f32 %v598_v44, 0.0 }
 0x30f   : > { %601 = vst.msk [vmem:[%s291_s8] sm:$0xff] %vm600_vm10, %v599_v45 }
 0x310   : > { %812 = shalt.err (!%p809_p5)
}
 0x311   : > { %s813_s23 = scalar_lea.hbm %s615_s18, 128  ;;  %s817_s30 = scalar_lea.hbm %s1072_s7, 256 }
 0x312   : > { %p814_p6 = scmp.ne.s32.totalorder %s615_s18, %s813_s23  ;;  %p818_p10 = scmp.lt.s32.totalorder %s615_s18, %s1072_s7 }
 0x313   : > { %p819_p11 = scmp.lt.s32.totalorder %s817_s30, %s813_s23 }
 0x314   : > { %p815_p7 = pnand %p814_p6, %p964_p4 }
 0x315   : > { %p820_p12 = por %p819_p11, %p818_p10 }
 0x316   : > { %p816_p9 = pneg %p815_p7 }
 0x318   : > { %p821_p13 = pnand %p820_p12, %p816_p9 }
 0x31a   : > { %824 = shalt.err (!%p821_p13)
}
 0x31b   : > { %736 = dma.vmem_to_hbm [thread:$0]  (%p964_p4), %s618_s10, 128, %s615_s18, %s603_s19  }
 0x31c PF: > { %p742_p0 = scmp.ge.s32.totalorder %s875_s29, 2  ;;  %s629_s17 = sand.u32 1, %s855_s24  }
 0x31d   : > { %s630_s20 = scalar_lea.sflag [#allocation3], %s629_s17 }
 0x31e   : > { %p739_p1 = pnand %p742_p0, %p971_p8 }
 0x320   : > { %p740_p2 = pneg %p739_p1 }
 0x322   : > { %850 = dma.done.wait (%p740_p2), %s630_s20, 128  }
 0x323   : > { %852 = vsyncadd (%p740_p2), %s630_s20, 4294967168  ;;  %s20_s29 = sadd.s32 1, %s875_s29   ;;  %s1075_s24 = smov %s859_s25 }
 0x324   : > { %p17_p3 = scmp.ge.s32.totalorder %s20_s29, 4   ;;  %s1076_s25 = smov %s863_s26 }
 0x325   : > { %s1077_s26 = smov %s977_s14  ;;  %s1078_s27 = smov %s871_s28 }
 0x326   : > { %s1079_s28 = smov %s1081_s9  ;;  %19 = sbr.rel (!%p17_p3) target bundleno = 4 (0x4), region = 83 }
 0x32b   :  { %635 = vsyncpa [#allocation3], 1 }
 0x32c   :  { %637 = vsyncpa [#allocation3 + $0x1], 1 }

</bundles_post_ra>
